<compile_context>
chip_gen: v5e
topology: v5e:2x2
jax: 0.10.0
libtpu: 0.0.40
codegen_flags: <defaults>
</compile_context>

<pallas_src>
import functools

import jax
import jax.numpy as jnp
from jax.experimental import pallas as pl
from jax.experimental.pallas import tpu as pltpu


def _round_up(v, m):
    return (v + m - 1) // m * m


def _make_ffn_kernel(num_layers, dims_p):
    """Fused MLP kernel for `num_layers` Linear layers with padded dims `dims_p`."""

    def kernel(x_ref, *refs):
        # refs = (w0, b0, ..., w_{L-1}, b_{L-1}, out_ref, h_scratch)
        h_ref = refs[-1]          # VMEM scratch for hidden activations
        out_ref = refs[-2]
        params = refs[:-2]
        for l in range(num_layers):
            # Operands in native dtype -> MXU runs at its bf16 peak when the
            # caller provides bf16 x / weights; accumulation is f32.
            lhs = x_ref[...] if l == 0 else h_ref[:, : dims_p[l]]
            w = params[2 * l][...]
            b = params[2 * l + 1][...].astype(jnp.float32)     # (1, dim_p)
            acc = jnp.dot(lhs, w, preferred_element_type=jnp.float32) + b
            if l < num_layers - 1:
                # ReLU in f32, stash in VMEM scratch in the compute dtype for
                # the next MXU pass (avoids holding the whole intermediate in
                # vregs at large row tiles).
                h_ref[:, : dims_p[l + 1]] = jnp.maximum(acc, 0.0).astype(h_ref.dtype)
            else:
                out_ref[...] = acc.astype(out_ref.dtype)

    return kernel


def init_ffn_params(key, dim_in, dim_hidden, dim_out, depth=2, dtype=jnp.float32):
    """Deterministic PyTorch-style (uniform +-1/sqrt(fan_in)) init."""
    dims = [dim_in] + [dim_hidden] * (depth - 1) + [dim_out]
    params = []
    for l in range(depth):
        fan_in, fan_out = dims[l], dims[l + 1]
        key, kw, kb = jax.random.split(key, 3)
        bound = 1.0 / (fan_in ** 0.5)
        w = jax.random.uniform(kw, (fan_in, fan_out), dtype, -bound, bound)
        b = jax.random.uniform(kb, (1, fan_out), dtype, -bound, bound)
        params.append((w, b))
    return params


@functools.partial(jax.jit, static_argnames=("row_tile", "single_buffer_weights"))
def _ffn_pallas(x, params, row_tile, single_buffer_weights):
    B, N, dim_in = x.shape
    num_layers = len(params)
    dim_out = params[-1][0].shape[1]
    dtype = x.dtype
    itemsize = jnp.dtype(dtype).itemsize

    M = B * N
    # Row tile: as large as requested (default 256) but don't pad tiny inputs
    # up to hundreds of rows; keep >=2 grid steps when possible so both v7x
    # TensorCores get work.  Always a multiple of 8 (sublane constraint).
    rt = min(row_tile, max(_round_up(-(-M // 2), 8), 8))
    grid_m = -(-M // rt)
    M_pad = grid_m * rt

    # Lane-dense padding: every feature dim -> multiple of 128.
    dims = [params[0][0].shape[0]] + [w.shape[1] for (w, _) in params]
    dims_p = tuple(_round_up(d, 128) for d in dims)
    inter_widths = dims_p[1:-1]
    hid_p = max(inter_widths) if inter_widths else 128

    x2d = x.reshape(M, dim_in)
    x2d = jnp.pad(x2d, ((0, M_pad - M), (0, dims_p[0] - dim_in)))

    if single_buffer_weights:
        # Grid-constant blocks: single-buffer to halve resident-weight VMEM.
        def const_spec(shape):
            return pl.BlockSpec(shape, lambda i: (0, 0),
                                pipeline_mode=pl.Buffered(1))
    else:
        def const_spec(shape):
            return pl.BlockSpec(shape, lambda i: (0, 0))

    flat_params = []
    in_specs = [pl.BlockSpec((rt, dims_p[0]), lambda i: (i, 0))]
    for l, (w, b) in enumerate(params):
        wp = jnp.pad(w, ((0, dims_p[l] - w.shape[0]),
                         (0, dims_p[l + 1] - w.shape[1])))
        bp = jnp.pad(b, ((0, 0), (0, dims_p[l + 1] - b.shape[1])))
        flat_params.extend([wp, bp])
        in_specs.append(const_spec(wp.shape))
        in_specs.append(const_spec(bp.shape))

    out_specs = pl.BlockSpec((rt, dims_p[-1]), lambda i: (i, 0))

    # Explicit VMEM budget: double-buffered x/out tiles + weights (+bias) +
    # hidden scratch, with headroom; capped at v7x's 64 MiB physical VMEM.
    w_bytes = sum(int(p.size) * p.dtype.itemsize for p in flat_params)
    need = (2 * rt * dims_p[0] * itemsize
            + 2 * rt * dims_p[-1] * itemsize
            + (1 if single_buffer_weights else 2) * w_bytes
            + rt * hid_p * itemsize)
    vmem_limit = int(min(max(2 * need + (4 << 20), 32 << 20), 64 << 20))

    out = pl.pallas_call(
        _make_ffn_kernel(num_layers, dims_p),
        out_shape=jax.ShapeDtypeStruct((M_pad, dims_p[-1]), dtype),
        grid_spec=pltpu.PrefetchScalarGridSpec(
            num_scalar_prefetch=0,
            grid=(grid_m,),
            in_specs=in_specs,
            out_specs=out_specs,
            scratch_shapes=[pltpu.VMEM((rt, hid_p), dtype)],
        ),
        compiler_params=pltpu.CompilerParams(
            dimension_semantics=("parallel",),
            vmem_limit_bytes=vmem_limit),
    )(x2d, *flat_params)

    return out[:M, :dim_out].reshape(B, N, dim_out)


def feed_forward_multilayer(x, params, row_tile=256):
    """x: (B, N, dim_in) -> (B, N, dim_out); fused MLP as one Pallas kernel."""
    params = tuple(params)
    try:
        # Preferred path: single-buffered (grid-constant) weights/biases.
        return jax.block_until_ready(_ffn_pallas(x, params, row_tile, True))
    except Exception:
        # Fallback if pl.Buffered(1) is rejected by this jax/libtpu build.
        return _ffn_pallas(x, params, row_tile, False)


def _reference(x, params):
    h = x
    for l, (w, b) in enumerate(params):
        h = h @ w + b[0]
        if l < len(params) - 1:
            h = jnp.maximum(h, 0.0)
    return h


if __name__ == "__main__":
    key = jax.random.PRNGKey(0)
    kx, kp = jax.random.split(key)

    B, N = 2, 256          # M = 512 rows -> row_tile=256, grid=(2,)
    dim_in, dim_hidden, dim_out = 32, 64, 32
    depth = 2              # module default

    x = jax.random.normal(kx, (B, N, dim_in), dtype=jnp.float32)
    params = init_ffn_params(kp, dim_in, dim_hidden, dim_out, depth=depth)

    out = feed_forward_multilayer(x, params)
    out = jax.block_until_ready(out)

    ref = _reference(x, params)
    assert out.shape == (B, N, dim_out)
    assert jnp.allclose(out, ref, atol=1e-5, rtol=1e-5), "mismatch vs reference"

    print("KERNEL_OK")
</pallas_src>

<mosaic_0001>
module attributes {stable_mosaic.version = 11 : i64} {
  func.func @kernel(%arg0: i32, %arg1: memref<256x128xf32, #tpu.memory_space<vmem>>, %arg2: memref<128x128xf32, #tpu.memory_space<vmem>>, %arg3: memref<1x128xf32, #tpu.memory_space<vmem>>, %arg4: memref<128x128xf32, #tpu.memory_space<vmem>>, %arg5: memref<1x128xf32, #tpu.memory_space<vmem>>, %arg6: memref<256x128xf32, #tpu.memory_space<vmem>>, %arg7: memref<256x128xf32, #tpu.memory_space<vmem>>) attributes {dimension_semantics = [#tpu.dimension_semantics<parallel>], iteration_bounds = array<i64: 2>, scalar_prefetch = 0 : i64, scratch_operands = 1 : i64, tpu.core_type = #tpu.core_type<tc>, window_params = [{transform_indices = @transform_0, window_bounds = array<i64: 256, 128>}, {pipeline_mode = #tpu.pipeline_mode<synchronous>, transform_indices = @transform_1, window_bounds = array<i64: 128, 128>}, {pipeline_mode = #tpu.pipeline_mode<synchronous>, transform_indices = @transform_2, window_bounds = array<i64: 1, 128>}, {pipeline_mode = #tpu.pipeline_mode<synchronous>, transform_indices = @transform_3, window_bounds = array<i64: 128, 128>}, {pipeline_mode = #tpu.pipeline_mode<synchronous>, transform_indices = @transform_4, window_bounds = array<i64: 1, 128>}, {transform_indices = @transform_5, window_bounds = array<i64: 256, 128>}]} {
    %c0 = arith.constant 0 : index
    %c0_0 = arith.constant 0 : index
    %0 = vector.load %arg1[%c0, %c0_0] : memref<256x128xf32, #tpu.memory_space<vmem>>, vector<256x128xf32>
    %c0_1 = arith.constant 0 : index
    %c0_2 = arith.constant 0 : index
    %1 = vector.load %arg2[%c0_1, %c0_2] : memref<128x128xf32, #tpu.memory_space<vmem>>, vector<128x128xf32>
    %c0_3 = arith.constant 0 : index
    %c0_4 = arith.constant 0 : index
    %2 = vector.load %arg3[%c0_3, %c0_4] : memref<1x128xf32, #tpu.memory_space<vmem>>, vector<1x128xf32>
    %cst = arith.constant dense<0.000000e+00> : vector<256x128xf32>
    %3 = tpu.matmul %0, %1, %cst {dimension_numbers = #tpu.dot_dimension_numbers<[1], [0], [0], [1], [0, 0, 1, 1], [], []>} : vector<256x128xf32>, vector<128x128xf32>, vector<256x128xf32> -> vector<256x128xf32>
    %4 = vector.broadcast %2 : vector<1x128xf32> to vector<256x128xf32>
    %5 = arith.addf %3, %4 : vector<256x128xf32>
    %cst_5 = arith.constant 0.000000e+00 : f32
    %6 = vector.broadcast %cst_5 : f32 to vector<256x128xf32>
    %7 = arith.maximumf %5, %6 : vector<256x128xf32>
    %c0_6 = arith.constant 0 : index
    %c0_7 = arith.constant 0 : index
    %8 = vector.load %arg7[%c0_6, %c0_7] : memref<256x128xf32, #tpu.memory_space<vmem>>, vector<256x128xf32>
    tpu.vector_store %arg7[%c0_6, %c0_7], %7 {strides = array<i32>} : memref<256x128xf32, #tpu.memory_space<vmem>>, vector<256x128xf32>,
    %c0_8 = arith.constant 0 : index
    %c0_9 = arith.constant 0 : index
    %9 = vector.load %arg7[%c0_8, %c0_9] : memref<256x128xf32, #tpu.memory_space<vmem>>, vector<256x128xf32>
    %c0_10 = arith.constant 0 : index
    %c0_11 = arith.constant 0 : index
    %10 = vector.load %arg4[%c0_10, %c0_11] : memref<128x128xf32, #tpu.memory_space<vmem>>, vector<128x128xf32>
    %c0_12 = arith.constant 0 : index
    %c0_13 = arith.constant 0 : index
    %11 = vector.load %arg5[%c0_12, %c0_13] : memref<1x128xf32, #tpu.memory_space<vmem>>, vector<1x128xf32>
    %cst_14 = arith.constant dense<0.000000e+00> : vector<256x128xf32>
    %12 = tpu.matmul %9, %10, %cst_14 {dimension_numbers = #tpu.dot_dimension_numbers<[1], [0], [0], [1], [0, 0, 1, 1], [], []>} : vector<256x128xf32>, vector<128x128xf32>, vector<256x128xf32> -> vector<256x128xf32>
    %13 = vector.broadcast %11 : vector<1x128xf32> to vector<256x128xf32>
    %14 = arith.addf %12, %13 : vector<256x128xf32>
    %c0_15 = arith.constant 0 : index
    %c0_16 = arith.constant 0 : index
    %15 = vector.load %arg6[%c0_15, %c0_16] : memref<256x128xf32, #tpu.memory_space<vmem>>, vector<256x128xf32>
    tpu.vector_store %arg6[%c0_15, %c0_16], %14 {strides = array<i32>} : memref<256x128xf32, #tpu.memory_space<vmem>>, vector<256x128xf32>,
    return
  }
  func.func @transform_0(%arg0: i32) -> (i32, i32) {
    %c0_i32 = arith.constant 0 : i32
    %c0_i32_0 = arith.constant 0 : i32
    return %arg0, %c0_i32 : i32, i32
  }
  func.func @transform_1(%arg0: i32) -> (i32, i32) {
    %c0_i32 = arith.constant 0 : i32
    %c0_i32_0 = arith.constant 0 : i32
    %c0_i32_1 = arith.constant 0 : i32
    return %c0_i32, %c0_i32_0 : i32, i32
  }
  func.func @transform_2(%arg0: i32) -> (i32, i32) {
    %c0_i32 = arith.constant 0 : i32
    %c0_i32_0 = arith.constant 0 : i32
    %c0_i32_1 = arith.constant 0 : i32
    return %c0_i32, %c0_i32_0 : i32, i32
  }
  func.func @transform_3(%arg0: i32) -> (i32, i32) {
    %c0_i32 = arith.constant 0 : i32
    %c0_i32_0 = arith.constant 0 : i32
    %c0_i32_1 = arith.constant 0 : i32
    return %c0_i32, %c0_i32_0 : i32, i32
  }
  func.func @transform_4(%arg0: i32) -> (i32, i32) {
    %c0_i32 = arith.constant 0 : i32
    %c0_i32_0 = arith.constant 0 : i32
    %c0_i32_1 = arith.constant 0 : i32
    return %c0_i32, %c0_i32_0 : i32, i32
  }
  func.func @transform_5(%arg0: i32) -> (i32, i32) {
    %c0_i32 = arith.constant 0 : i32
    %c0_i32_0 = arith.constant 0 : i32
    return %arg0, %c0_i32 : i32, i32
  }
}

module attributes {stable_mosaic.version = 11 : i64} {
  func.func @kernel(%arg0: i32, %arg1: memref<256x128xf32, #tpu.memory_space<vmem>>, %arg2: memref<128x128xf32, #tpu.memory_space<vmem>>, %arg3: memref<1x128xf32, #tpu.memory_space<vmem>>, %arg4: memref<128x128xf32, #tpu.memory_space<vmem>>, %arg5: memref<1x128xf32, #tpu.memory_space<vmem>>, %arg6: memref<256x128xf32, #tpu.memory_space<vmem>>, %arg7: memref<256x128xf32, #tpu.memory_space<vmem>>) attributes {dimension_semantics = [#tpu.dimension_semantics<parallel>], iteration_bounds = array<i64: 2>, scalar_prefetch = 0 : i64, scratch_operands = 1 : i64, tpu.core_type = #tpu.core_type<tc>, window_params = [{transform_indices = @transform_0, window_bounds = array<i64: 256, 128>}, {pipeline_mode = #tpu.pipeline_mode<synchronous>, transform_indices = @transform_1, window_bounds = array<i64: 128, 128>}, {pipeline_mode = #tpu.pipeline_mode<synchronous>, transform_indices = @transform_2, window_bounds = array<i64: 1, 128>}, {pipeline_mode = #tpu.pipeline_mode<synchronous>, transform_indices = @transform_3, window_bounds = array<i64: 128, 128>}, {pipeline_mode = #tpu.pipeline_mode<synchronous>, transform_indices = @transform_4, window_bounds = array<i64: 1, 128>}, {transform_indices = @transform_5, window_bounds = array<i64: 256, 128>}]} {
    %c0 = arith.constant 0 : index
    %c0_0 = arith.constant 0 : index
    %0 = vector.load %arg1[%c0, %c0_0] : memref<256x128xf32, #tpu.memory_space<vmem>>, vector<256x128xf32>
    %c0_1 = arith.constant 0 : index
    %c0_2 = arith.constant 0 : index
    %1 = vector.load %arg2[%c0_1, %c0_2] : memref<128x128xf32, #tpu.memory_space<vmem>>, vector<128x128xf32>
    %c0_3 = arith.constant 0 : index
    %c0_4 = arith.constant 0 : index
    %2 = vector.load %arg3[%c0_3, %c0_4] : memref<1x128xf32, #tpu.memory_space<vmem>>, vector<1x128xf32>
    %cst = arith.constant dense<0.000000e+00> : vector<256x128xf32>
    %3 = tpu.matmul %0, %1, %cst {dimension_numbers = #tpu.dot_dimension_numbers<[1], [0], [0], [1], [0, 0, 1, 1], [], []>} : vector<256x128xf32>, vector<128x128xf32>, vector<256x128xf32> -> vector<256x128xf32>
    %4 = vector.broadcast %2 : vector<1x128xf32> to vector<256x128xf32>
    %5 = arith.addf %3, %4 : vector<256x128xf32>
    %cst_5 = arith.constant 0.000000e+00 : f32
    %6 = vector.broadcast %cst_5 : f32 to vector<256x128xf32>
    %7 = arith.maximumf %5, %6 : vector<256x128xf32>
    %c0_6 = arith.constant 0 : index
    %c0_7 = arith.constant 0 : index
    %8 = vector.load %arg7[%c0_6, %c0_7] : memref<256x128xf32, #tpu.memory_space<vmem>>, vector<256x128xf32>
    tpu.vector_store %arg7[%c0_6, %c0_7], %7 {strides = array<i32>} : memref<256x128xf32, #tpu.memory_space<vmem>>, vector<256x128xf32>,
    %c0_8 = arith.constant 0 : index
    %c0_9 = arith.constant 0 : index
    %9 = vector.load %arg7[%c0_8, %c0_9] : memref<256x128xf32, #tpu.memory_space<vmem>>, vector<256x128xf32>
    %c0_10 = arith.constant 0 : index
    %c0_11 = arith.constant 0 : index
    %10 = vector.load %arg4[%c0_10, %c0_11] : memref<128x128xf32, #tpu.memory_space<vmem>>, vector<128x128xf32>
    %c0_12 = arith.constant 0 : index
    %c0_13 = arith.constant 0 : index
    %11 = vector.load %arg5[%c0_12, %c0_13] : memref<1x128xf32, #tpu.memory_space<vmem>>, vector<1x128xf32>
    %cst_14 = arith.constant dense<0.000000e+00> : vector<256x128xf32>
    %12 = tpu.matmul %9, %10, %cst_14 {dimension_numbers = #tpu.dot_dimension_numbers<[1], [0], [0], [1], [0, 0, 1, 1], [], []>} : vector<256x128xf32>, vector<128x128xf32>, vector<256x128xf32> -> vector<256x128xf32>
    %13 = vector.broadcast %11 : vector<1x128xf32> to vector<256x128xf32>
    %14 = arith.addf %12, %13 : vector<256x128xf32>
    %c0_15 = arith.constant 0 : index
    %c0_16 = arith.constant 0 : index
    %15 = vector.load %arg6[%c0_15, %c0_16] : memref<256x128xf32, #tpu.memory_space<vmem>>, vector<256x128xf32>
    tpu.vector_store %arg6[%c0_15, %c0_16], %14 {strides = array<i32>} : memref<256x128xf32, #tpu.memory_space<vmem>>, vector<256x128xf32>,
    return
  }
  func.func @transform_0(%arg0: i32) -> (i32, i32) {
    %c0_i32 = arith.constant 0 : i32
    %c0_i32_0 = arith.constant 0 : i32
    return %arg0, %c0_i32 : i32, i32
  }
  func.func @transform_1(%arg0: i32) -> (i32, i32) {
    %c0_i32 = arith.constant 0 : i32
    %c0_i32_0 = arith.constant 0 : i32
    %c0_i32_1 = arith.constant 0 : i32
    return %c0_i32, %c0_i32_0 : i32, i32
  }
  func.func @transform_2(%arg0: i32) -> (i32, i32) {
    %c0_i32 = arith.constant 0 : i32
    %c0_i32_0 = arith.constant 0 : i32
    %c0_i32_1 = arith.constant 0 : i32
    return %c0_i32, %c0_i32_0 : i32, i32
  }
  func.func @transform_3(%arg0: i32) -> (i32, i32) {
    %c0_i32 = arith.constant 0 : i32
    %c0_i32_0 = arith.constant 0 : i32
    %c0_i32_1 = arith.constant 0 : i32
    return %c0_i32, %c0_i32_0 : i32, i32
  }
  func.func @transform_4(%arg0: i32) -> (i32, i32) {
    %c0_i32 = arith.constant 0 : i32
    %c0_i32_0 = arith.constant 0 : i32
    %c0_i32_1 = arith.constant 0 : i32
    return %c0_i32, %c0_i32_0 : i32, i32
  }
  func.func @transform_5(%arg0: i32) -> (i32, i32) {
    %c0_i32 = arith.constant 0 : i32
    %c0_i32_0 = arith.constant 0 : i32
    return %arg0, %c0_i32 : i32, i32
  }
}

</mosaic_0001>

<bundles_post_ra>
// kernel: _ffn_pallas.1
= control target key start
LH: loop header
LB: loop body
LE: loop exit
PB: predicated region body
PF: predicated region fallthrough
CT: control target
= control target key end

     0   :  { %s801_s18 = smov 0   ;;  %s1063_s0 = inlined_call_operand.vmem [shape: f32[512,128], index: 0, kind: input, shape index: {}]   ;;  %s1064_s1 = inlined_call_operand.vmem [shape: f32[128,128], index: 1, kind: input, shape index: {}]   ;;  %s1065_s2 = inlined_call_operand.vmem [shape: f32[1,128], index: 2, kind: input, shape index: {}]   ;;  %s1066_s3 = inlined_call_operand.vmem [shape: f32[128,128], index: 3, kind: input, shape index: {}]   ;;  %s1067_s4 = inlined_call_operand.vmem [shape: f32[1,128], index: 4, kind: input, shape index: {}]   ;;  %s1068_s5 = inlined_call_operand.vmem [shape: f32[512,128], index: 5, kind: output, shape index: {}]  }
   0x1 LB: > { %s710_s19 = sadd.s32 4294967295, %s769_s18   ;;  %p714_p0 = scmp.ge.s32.totalorder %s769_s18, 1  ;;  %s769_s18 = sphi %s801_s18, %s15_s18  }
   0x2   : > { %p188_p1 = scmp.lt.s32.totalorder %s769_s18, 3 }
   0x4   : > { %p189_p2 = pnand %p714_p0, %p188_p1 }
   0x5   : > { %s715_s11 = sshll.u32 (!%p189_p2), %s710_s19, 5 }
   0x6   : > { %192 = sbr.rel (%p189_p2) target bundleno = 434 (0x1b2), region = 40  ;;  %p217_p3 = scmp.lt.s32.totalorder (!%p189_p2), %s715_s11, 63 }
   0xb   : > { %v275_v0 = vld [vmem:[%s1064_s1 + $0x78] sm:$0xff]  ;;  %v274_v1 = vld [vmem:[%s1064_s1 + $0x70] sm:$0xff]  ;;  %v273_v2 = vld [vmem:[%s1064_s1 + $0x68] sm:$0xff]  ;;  %s1070_s11 = smov (!%p217_p3, %s715_s11), 63 }
   0xc   : > { %721 = vmatpush.msra.mxu2 %v275_v0  ;;  %280 = vmatpush.msra.mxu0 %v275_v0  ;;  %v272_v3 = vld [vmem:[%s1064_s1 + $0x60] sm:$0xff]  ;;  %v271_v4 = vld [vmem:[%s1064_s1 + $0x58] sm:$0xff]  ;;  %v270_v5 = vld [vmem:[%s1064_s1 + $0x50] sm:$0xff]  ;;  %s716_s23 = sshll.u32 %s1070_s11, 3 }
   0xd   : > { %v269_v6 = vld [vmem:[%s1064_s1 + $0x48] sm:$0xff]  ;;  %v268_v7 = vld [vmem:[%s1064_s1 + $0x40] sm:$0xff]  ;;  %v267_v8 = vld [vmem:[%s1064_s1 + $0x38] sm:$0xff]  ;;  %s862_s30 = scalar_lea.vmem %s1063_s0, %s716_s23  ;;  %s994_s27 = scalar_lea.vmem %s1068_s5, %s716_s23 }
   0xe   : > { %722 = vmatpush.msra.mxu2 %v274_v1  ;;  %281 = vmatpush.msra.mxu0 %v274_v1  ;;  %v266_v9 = vld [vmem:[%s1064_s1 + $0x30] sm:$0xff]  ;;  %v265_v10 = vld [vmem:[%s1064_s1 + $0x28] sm:$0xff]  ;;  %v264_v11 = vld [vmem:[%s1064_s1 + $0x20] sm:$0xff] }
   0xf   : > { %v263_v12 = vld [vmem:[%s1064_s1 + $0x18] sm:$0xff]  ;;  %v262_v13 = vld [vmem:[%s1064_s1 + $0x10] sm:$0xff]  ;;  %v261_v14 = vld [vmem:[%s1064_s1 + $0x8] sm:$0xff] }
  0x10   : > { %723 = vmatpush.msra.mxu2 %v273_v2  ;;  %282 = vmatpush.msra.mxu0 %v273_v2  ;;  %v260_v15 = vld [vmem:[%s1064_s1] sm:$0xff]  ;;  %v245_v18 = vld [vmem:[%s862_s30 + $0x88] sm:$0xff]  ;;  %v246_v20 = vld [vmem:[%s862_s30 + $0x90] sm:$0xff] }
  0x11   : > { %v244_v16 = vld [vmem:[%s862_s30 + $0x80] sm:$0xff]  ;;  %v229_v19 = vld [vmem:[%s862_s30 + $0x8] sm:$0xff]  ;;  %v230_v21 = vld [vmem:[%s862_s30 + $0x10] sm:$0xff] }
  0x12   : > { %724 = vmatpush.msra.mxu2 %v272_v3  ;;  %283 = vmatpush.msra.mxu0 %v272_v3  ;;  %v228_v17 = vld [vmem:[%s862_s30] sm:$0xff]  ;;  %v247_v22 = vld [vmem:[%s862_s30 + $0x98] sm:$0xff]  ;;  %v249_v26 = vld [vmem:[%s862_s30 + $0xa8] sm:$0xff] }
  0x13   : > { %v231_v23 = vld [vmem:[%s862_s30 + $0x18] sm:$0xff]  ;;  %v248_v24 = vld [vmem:[%s862_s30 + $0xa0] sm:$0xff]  ;;  %v233_v27 = vld [vmem:[%s862_s30 + $0x28] sm:$0xff] }
  0x14   : > { %725 = vmatpush.msra.mxu2 %v271_v4  ;;  %284 = vmatpush.msra.mxu0 %v271_v4  ;;  %v232_v25 = vld [vmem:[%s862_s30 + $0x20] sm:$0xff]  ;;  %v250_v28 = vld [vmem:[%s862_s30 + $0xb0] sm:$0xff]  ;;  %v251_v30 = vld [vmem:[%s862_s30 + $0xb8] sm:$0xff] }
  0x15   : > { %v234_v29 = vld [vmem:[%s862_s30 + $0x30] sm:$0xff]  ;;  %v235_v31 = vld [vmem:[%s862_s30 + $0x38] sm:$0xff]  ;;  %v252_v32 = vld [vmem:[%s862_s30 + $0xc0] sm:$0xff] }
  0x16   : > { %726 = vmatpush.msra.mxu2 %v270_v5  ;;  %285 = vmatpush.msra.mxu0 %v270_v5  ;;  %v236_v33 = vld [vmem:[%s862_s30 + $0x40] sm:$0xff]  ;;  %v253_v34 = vld [vmem:[%s862_s30 + $0xc8] sm:$0xff]  ;;  %v504_v36 = vld [vmem:[%s1066_s3 + $0x78] sm:$0xff] }
  0x17   : > { %v237_v35 = vld [vmem:[%s862_s30 + $0x48] sm:$0xff]  ;;  %v503_v37 = vld [vmem:[%s1066_s3 + $0x70] sm:$0xff]  ;;  %737 = vmatpush.msra.mxu3 %v504_v36  ;;  %509 = vmatpush.msra.mxu1 %v504_v36  ;;  %v501_v39 = vld [vmem:[%s1066_s3 + $0x60] sm:$0xff] }
  0x18   : > { %727 = vmatpush.msra.mxu2 %v269_v6  ;;  %286 = vmatpush.msra.mxu0 %v269_v6  ;;  %v502_v38 = vld [vmem:[%s1066_s3 + $0x68] sm:$0xff]  ;;  %v254_v40 = vld [vmem:[%s862_s30 + $0xd0] sm:$0xff]  ;;  %v500_v42 = vld [vmem:[%s1066_s3 + $0x58] sm:$0xff] }
  0x19   : > { %738 = vmatpush.msra.mxu3 %v503_v37  ;;  %510 = vmatpush.msra.mxu1 %v503_v37  ;;  %v238_v41 = vld [vmem:[%s862_s30 + $0x50] sm:$0xff]  ;;  %v498_v44 = vld [vmem:[%s1066_s3 + $0x48] sm:$0xff]  ;;  %v497_v45 = vld [vmem:[%s1066_s3 + $0x40] sm:$0xff] }
  0x1a   : > { %728 = vmatpush.msra.mxu2 %v268_v7  ;;  %287 = vmatpush.msra.mxu0 %v268_v7  ;;  %v499_v43 = vld [vmem:[%s1066_s3 + $0x50] sm:$0xff]  ;;  %v255_v46 = vld [vmem:[%s862_s30 + $0xd8] sm:$0xff]  ;;  %v494_v50 = vld [vmem:[%s1066_s3 + $0x28] sm:$0xff] }
  0x1b   : > { %739 = vmatpush.msra.mxu3 %v502_v38  ;;  %511 = vmatpush.msra.mxu1 %v502_v38  ;;  %v239_v47 = vld [vmem:[%s862_s30 + $0x58] sm:$0xff]  ;;  %v495_v49 = vld [vmem:[%s1066_s3 + $0x30] sm:$0xff]  ;;  %v493_v51 = vld [vmem:[%s1066_s3 + $0x20] sm:$0xff] }
  0x1c   : > { %729 = vmatpush.msra.mxu2 %v267_v8  ;;  %288 = vmatpush.msra.mxu0 %v267_v8  ;;  %v496_v48 = vld [vmem:[%s1066_s3 + $0x38] sm:$0xff]  ;;  %v256_v52 = vld [vmem:[%s862_s30 + $0xe0] sm:$0xff]  ;;  %v491_v55 = vld [vmem:[%s1066_s3 + $0x10] sm:$0xff] }
  0x1d   : > { %740 = vmatpush.msra.mxu3 %v501_v39  ;;  %512 = vmatpush.msra.mxu1 %v501_v39  ;;  %v240_v53 = vld [vmem:[%s862_s30 + $0x60] sm:$0xff]  ;;  %v492_v54 = vld [vmem:[%s1066_s3 + $0x18] sm:$0xff]  ;;  %v490_v56 = vld [vmem:[%s1066_s3 + $0x8] sm:$0xff] }
  0x1e   : > { %730 = vmatpush.msra.mxu2 %v266_v9  ;;  %289 = vmatpush.msra.mxu0 %v266_v9  ;;  %v257_v57 = vld [vmem:[%s862_s30 + $0xe8] sm:$0xff]  ;;  %v489_v59 = vld [vmem:[%s1066_s3] sm:$0xff]  ;;  %v258_v60 = vld [vmem:[%s862_s30 + $0xf0] sm:$0xff] }
  0x1f   : > { %741 = vmatpush.msra.mxu3 %v500_v42  ;;  %513 = vmatpush.msra.mxu1 %v500_v42  ;;  %v241_v58 = vld [vmem:[%s862_s30 + $0x68] sm:$0xff]  ;;  %v242_v61 = vld [vmem:[%s862_s30 + $0x70] sm:$0xff]  ;;  %v259_v62 = vld [vmem:[%s862_s30 + $0xf8] sm:$0xff] }
  0x20   : > { %731 = vmatpush.msra.mxu2 %v265_v10  ;;  %290 = vmatpush.msra.mxu0 %v265_v10  ;;  %v243_v63 = vld [vmem:[%s862_s30 + $0x78] sm:$0xff]  ;;  %v950_v0 = vld [vmem:[%s1065_s2] ss:$0 sm:$0xff] }
  0x21   : > { %742 = vmatpush.msra.mxu3 %v499_v43  ;;  %514 = vmatpush.msra.mxu1 %v499_v43 }
  0x22   : > { %732 = vmatpush.msra.mxu2 %v264_v11  ;;  %291 = vmatpush.msra.mxu0 %v264_v11 }
  0x23   : > { %743 = vmatpush.msra.mxu3 %v498_v44  ;;  %515 = vmatpush.msra.mxu1 %v498_v44 }
  0x24   : > { %733 = vmatpush.msra.mxu2 %v263_v12  ;;  %292 = vmatpush.msra.mxu0 %v263_v12 }
  0x25   : > { %744 = vmatpush.msra.mxu3 %v497_v45  ;;  %516 = vmatpush.msra.mxu1 %v497_v45 }
  0x26   : > { %734 = vmatpush.msra.mxu2 %v262_v13  ;;  %293 = vmatpush.msra.mxu0 %v262_v13 }
  0x27   : > { %745 = vmatpush.msra.mxu3 %v496_v48  ;;  %517 = vmatpush.msra.mxu1 %v496_v48 }
  0x28   : > { %735 = vmatpush.msra.mxu2 %v261_v14  ;;  %294 = vmatpush.msra.mxu0 %v261_v14 }
  0x29   : > { %746 = vmatpush.msra.mxu3 %v495_v49  ;;  %518 = vmatpush.msra.mxu1 %v495_v49 }
  0x2a   : > { %736 = vmatpush.msra.mxu2 %v260_v15  ;;  %295 = vmatpush.msra.mxu0 %v260_v15 }
  0x2b   : > { %344 = vmatmul.f32.vlgmr.msra.gmra.mxu2 %v244_v16  ;;  %296 = vmatmul.f32.vlgmr.msra.gmra.mxu0 %v228_v17 }
  0x2c   : > { %747 = vmatpush.msra.mxu3 %v494_v50  ;;  %519 = vmatpush.msra.mxu1 %v494_v50 }
  0x2e   : > { %748 = vmatpush.msra.mxu3 %v493_v51  ;;  %520 = vmatpush.msra.mxu1 %v493_v51 }
  0x30   : > { %749 = vmatpush.msra.mxu3 %v492_v54  ;;  %521 = vmatpush.msra.mxu1 %v492_v54 }
  0x32   : > { %750 = vmatpush.msra.mxu3 %v491_v55  ;;  %522 = vmatpush.msra.mxu1 %v491_v55 }
  0x33   : > { %347 = vmatmul.f32.gmra.mxu2 %v245_v18  ;;  %299 = vmatmul.f32.gmra.mxu0 %v229_v19 }
  0x34   : > { %751 = vmatpush.msra.mxu3 %v490_v56  ;;  %523 = vmatpush.msra.mxu1 %v490_v56 }
  0x36   : > { %752 = vmatpush.msra.mxu3 %v489_v59  ;;  %524 = vmatpush.msra.mxu1 %v489_v59 }
  0x3b   : > { %350 = vmatmul.f32.gmra.mxu2 %v246_v20  ;;  %302 = vmatmul.f32.gmra.mxu0 %v230_v21 }
  0x43   : > { %353 = vmatmul.f32.gmra.mxu2 %v247_v22  ;;  %305 = vmatmul.f32.gmra.mxu0 %v231_v23 }
  0x4b   : > { %356 = vmatmul.f32.gmra.mxu2 %v248_v24  ;;  %308 = vmatmul.f32.gmra.mxu0 %v232_v25 }
  0x53   : > { %359 = vmatmul.f32.gmra.mxu2 %v249_v26  ;;  %311 = vmatmul.f32.gmra.mxu0 %v233_v27 }
  0x5b   : > { %362 = vmatmul.f32.gmra.mxu2 %v250_v28  ;;  %314 = vmatmul.f32.gmra.mxu0 %v234_v29 }
  0x63   : > { %365 = vmatmul.f32.gmra.mxu2 %v251_v30  ;;  %317 = vmatmul.f32.gmra.mxu0 %v235_v31 }
  0x6b   : > { %368 = vmatmul.f32.gmra.mxu2 %v252_v32  ;;  %320 = vmatmul.f32.gmra.mxu0 %v236_v33 }
  0x73   : > { %371 = vmatmul.f32.gmra.mxu2 %v253_v34  ;;  %323 = vmatmul.f32.gmra.mxu0 %v237_v35 }
  0x7b   : > { %374 = vmatmul.f32.gmra.mxu2 %v254_v40  ;;  %326 = vmatmul.f32.gmra.mxu0 %v238_v41 }
  0x83   : > { %377 = vmatmul.f32.gmra.mxu2 %v255_v46  ;;  %329 = vmatmul.f32.gmra.mxu0 %v239_v47 }
  0x8b   : > { %380 = vmatmul.f32.gmra.mxu2 %v256_v52  ;;  %332 = vmatmul.f32.gmra.mxu0 %v240_v53 }
  0x93   : > { %383 = vmatmul.f32.gmra.mxu2 %v257_v57  ;;  %335 = vmatmul.f32.gmra.mxu0 %v241_v58 }
  0x9b   : > { %386 = vmatmul.f32.gmra.mxu2 %v258_v60  ;;  %338 = vmatmul.f32.gmra.mxu0 %v242_v61 }
  0xa3   : > { %389 = vmatmul.f32.gmra.mxu2 %v259_v62  ;;  %341 = vmatmul.f32.gmra.mxu0 %v243_v63 }
  0xa8   : > { %v297_v1 = vpop.f32.mrf.mxu0 }
  0xa9   : > { %v298_v2 = vadd.f32 %v950_v0, %v297_v1 }
  0xab   : > { %v393_v3 = vmax.f32 %v298_v2, 0.0 }
  0xad   : > { %525 = vmatmul.f32.vlgmr.msra.gmra.mxu1 %v393_v3 }
  0xae   : > { %v345_v4 = vpop.f32.mrf.mxu2 }
  0xaf   : > { %v346_v5 = vadd.f32 %v950_v0, %v345_v4 }
  0xb0   : > { %v300_v6 = vpop.f32.mrf.mxu0 }
  0xb1   : > { %v409_v7 = vmax.f32 %v346_v5, 0.0  ;;  %v301_v8 = vadd.f32 %v950_v0, %v300_v6 }
  0xb3   : > { %573 = vmatmul.f32.vlgmr.msra.gmra.mxu3 %v409_v7  ;;  %v394_v9 = vmax.f32 %v301_v8, 0.0 }
  0xb5   : > { %528 = vmatmul.f32.gmra.mxu1 %v394_v9 }
  0xb6   : > { %v348_v10 = vpop.f32.mrf.mxu2 }
  0xb7   : > { %v349_v11 = vadd.f32 %v950_v0, %v348_v10 }
  0xb8   : > { %v303_v12 = vpop.f32.mrf.mxu0 }
  0xb9   : > { %v410_v13 = vmax.f32 %v349_v11, 0.0  ;;  %v304_v14 = vadd.f32 %v950_v0, %v303_v12 }
  0xbb   : > { %576 = vmatmul.f32.gmra.mxu3 %v410_v13  ;;  %v395_v15 = vmax.f32 %v304_v14, 0.0 }
  0xbd   : > { %531 = vmatmul.f32.gmra.mxu1 %v395_v15 }
  0xbe   : > { %v351_v16 = vpop.f32.mrf.mxu2 }
  0xbf   : > { %v352_v17 = vadd.f32 %v950_v0, %v351_v16 }
  0xc0   : > { %v306_v18 = vpop.f32.mrf.mxu0 }
  0xc1   : > { %v411_v19 = vmax.f32 %v352_v17, 0.0  ;;  %v307_v20 = vadd.f32 %v950_v0, %v306_v18 }
  0xc3   : > { %579 = vmatmul.f32.gmra.mxu3 %v411_v19  ;;  %v396_v21 = vmax.f32 %v307_v20, 0.0 }
  0xc5   : > { %534 = vmatmul.f32.gmra.mxu1 %v396_v21 }
  0xc6   : > { %v354_v22 = vpop.f32.mrf.mxu2 }
  0xc7   : > { %v355_v23 = vadd.f32 %v950_v0, %v354_v22 }
  0xc8   : > { %v309_v24 = vpop.f32.mrf.mxu0 }
  0xc9   : > { %v412_v25 = vmax.f32 %v355_v23, 0.0  ;;  %v310_v26 = vadd.f32 %v950_v0, %v309_v24 }
  0xcb   : > { %582 = vmatmul.f32.gmra.mxu3 %v412_v25  ;;  %v397_v27 = vmax.f32 %v310_v26, 0.0 }
  0xcd   : > { %537 = vmatmul.f32.gmra.mxu1 %v397_v27 }
  0xce   : > { %v357_v28 = vpop.f32.mrf.mxu2 }
  0xcf   : > { %v358_v29 = vadd.f32 %v950_v0, %v357_v28 }
  0xd0   : > { %v312_v30 = vpop.f32.mrf.mxu0 }
  0xd1   : > { %v413_v31 = vmax.f32 %v358_v29, 0.0  ;;  %v313_v32 = vadd.f32 %v950_v0, %v312_v30 }
  0xd3   : > { %585 = vmatmul.f32.gmra.mxu3 %v413_v31  ;;  %v398_v33 = vmax.f32 %v313_v32, 0.0 }
  0xd5   : > { %540 = vmatmul.f32.gmra.mxu1 %v398_v33  ;;  %v987_v33 = vld [vmem:[%s1067_s4] ss:$0 sm:$0xff] }
  0xd6   : > { %v360_v34 = vpop.f32.mrf.mxu2 }
  0xd7   : > { %v361_v35 = vadd.f32 %v950_v0, %v360_v34 }
  0xd8   : > { %v315_v36 = vpop.f32.mrf.mxu0 }
  0xd9   : > { %v414_v37 = vmax.f32 %v361_v35, 0.0  ;;  %v316_v38 = vadd.f32 %v950_v0, %v315_v36 }
  0xdb   : > { %588 = vmatmul.f32.gmra.mxu3 %v414_v37  ;;  %v399_v39 = vmax.f32 %v316_v38, 0.0 }
  0xdd   : > { %543 = vmatmul.f32.gmra.mxu1 %v399_v39 }
  0xde   : > { %v363_v40 = vpop.f32.mrf.mxu2 }
  0xdf   : > { %v364_v41 = vadd.f32 %v950_v0, %v363_v40 }
  0xe0   : > { %v318_v42 = vpop.f32.mrf.mxu0 }
  0xe1   : > { %v415_v43 = vmax.f32 %v364_v41, 0.0  ;;  %v319_v44 = vadd.f32 %v950_v0, %v318_v42 }
  0xe3   : > { %591 = vmatmul.f32.gmra.mxu3 %v415_v43  ;;  %v400_v45 = vmax.f32 %v319_v44, 0.0 }
  0xe5   : > { %546 = vmatmul.f32.gmra.mxu1 %v400_v45 }
  0xe6   : > { %v366_v46 = vpop.f32.mrf.mxu2 }
  0xe7   : > { %v367_v47 = vadd.f32 %v950_v0, %v366_v46 }
  0xe8   : > { %v321_v48 = vpop.f32.mrf.mxu0 }
  0xe9   : > { %v416_v49 = vmax.f32 %v367_v47, 0.0  ;;  %v322_v50 = vadd.f32 %v950_v0, %v321_v48 }
  0xeb   : > { %594 = vmatmul.f32.gmra.mxu3 %v416_v49  ;;  %v401_v51 = vmax.f32 %v322_v50, 0.0 }
  0xed   : > { %549 = vmatmul.f32.gmra.mxu1 %v401_v51 }
  0xee   : > { %v369_v52 = vpop.f32.mrf.mxu2 }
  0xef   : > { %v370_v53 = vadd.f32 %v950_v0, %v369_v52 }
  0xf0   : > { %v324_v54 = vpop.f32.mrf.mxu0 }
  0xf1   : > { %v417_v55 = vmax.f32 %v370_v53, 0.0  ;;  %v325_v56 = vadd.f32 %v950_v0, %v324_v54 }
  0xf3   : > { %597 = vmatmul.f32.gmra.mxu3 %v417_v55  ;;  %v402_v57 = vmax.f32 %v325_v56, 0.0 }
  0xf5   : > { %552 = vmatmul.f32.gmra.mxu1 %v402_v57 }
  0xf6   : > { %v372_v58 = vpop.f32.mrf.mxu2 }
  0xf7   : > { %v373_v59 = vadd.f32 %v950_v0, %v372_v58 }
  0xf8   : > { %v327_v60 = vpop.f32.mrf.mxu0 }
  0xf9   : > { %v418_v61 = vmax.f32 %v373_v59, 0.0  ;;  %v328_v62 = vadd.f32 %v950_v0, %v327_v60 }
  0xfb   : > { %600 = vmatmul.f32.gmra.mxu3 %v418_v61  ;;  %v403_v63 = vmax.f32 %v328_v62, 0.0 }
  0xfd   : > { %555 = vmatmul.f32.gmra.mxu1 %v403_v63 }
  0xfe   : > { %v375_v1 = vpop.f32.mrf.mxu2 }
  0xff   : > { %v376_v2 = vadd.f32 %v950_v0, %v375_v1 }
 0x100   : > { %v330_v3 = vpop.f32.mrf.mxu0 }
 0x101   : > { %v419_v4 = vmax.f32 %v376_v2, 0.0  ;;  %v331_v5 = vadd.f32 %v950_v0, %v330_v3 }
 0x103   : > { %603 = vmatmul.f32.gmra.mxu3 %v419_v4  ;;  %v404_v6 = vmax.f32 %v331_v5, 0.0 }
 0x105   : > { %558 = vmatmul.f32.gmra.mxu1 %v404_v6 }
 0x106   : > { %v378_v7 = vpop.f32.mrf.mxu2 }
 0x107   : > { %v379_v8 = vadd.f32 %v950_v0, %v378_v7 }
 0x108   : > { %v333_v9 = vpop.f32.mrf.mxu0 }
 0x109   : > { %v420_v10 = vmax.f32 %v379_v8, 0.0  ;;  %v334_v11 = vadd.f32 %v950_v0, %v333_v9 }
 0x10b   : > { %606 = vmatmul.f32.gmra.mxu3 %v420_v10  ;;  %v405_v12 = vmax.f32 %v334_v11, 0.0 }
 0x10d   : > { %561 = vmatmul.f32.gmra.mxu1 %v405_v12 }
 0x10e   : > { %v381_v13 = vpop.f32.mrf.mxu2 }
 0x10f   : > { %v382_v14 = vadd.f32 %v950_v0, %v381_v13 }
 0x110   : > { %v336_v15 = vpop.f32.mrf.mxu0 }
 0x111   : > { %v421_v16 = vmax.f32 %v382_v14, 0.0  ;;  %v337_v17 = vadd.f32 %v950_v0, %v336_v15 }
 0x113   : > { %609 = vmatmul.f32.gmra.mxu3 %v421_v16  ;;  %v406_v18 = vmax.f32 %v337_v17, 0.0 }
 0x115   : > { %564 = vmatmul.f32.gmra.mxu1 %v406_v18 }
 0x116   : > { %v384_v19 = vpop.f32.mrf.mxu2 }
 0x117   : > { %v385_v20 = vadd.f32 %v950_v0, %v384_v19 }
 0x118   : > { %v339_v21 = vpop.f32.mrf.mxu0 }
 0x119   : > { %v422_v22 = vmax.f32 %v385_v20, 0.0  ;;  %v340_v23 = vadd.f32 %v950_v0, %v339_v21 }
 0x11b   : > { %612 = vmatmul.f32.gmra.mxu3 %v422_v22  ;;  %v407_v24 = vmax.f32 %v340_v23, 0.0 }
 0x11d   : > { %567 = vmatmul.f32.gmra.mxu1 %v407_v24 }
 0x11e   : > { %v387_v25 = vpop.f32.mrf.mxu2 }
 0x11f   : > { %v388_v26 = vadd.f32 %v950_v0, %v387_v25 }
 0x120   : > { %v342_v27 = vpop.f32.mrf.mxu0 }
 0x121   : > { %v423_v28 = vmax.f32 %v388_v26, 0.0  ;;  %v343_v29 = vadd.f32 %v950_v0, %v342_v27 }
 0x123   : > { %615 = vmatmul.f32.gmra.mxu3 %v423_v28  ;;  %v408_v30 = vmax.f32 %v343_v29, 0.0 }
 0x125   : > { %570 = vmatmul.f32.gmra.mxu1 %v408_v30 }
 0x126   : > { %v390_v31 = vpop.f32.mrf.mxu2 }
 0x127   : > { %v391_v32 = vadd.f32 %v950_v0, %v390_v31 }
 0x129   : > { %v424_v34 = vmax.f32 %v391_v32, 0.0 }
 0x12a   : > { %v526_v35 = vpop.f32.mrf.mxu1 }
 0x12b   : > { %618 = vmatmul.f32.gmra.mxu3 %v424_v34  ;;  %v527_v0 = vadd.f32 %v987_v33, %v526_v35 }
 0x12d   : > { %622 = vst [vmem:[%s994_s27] sm:$0xff] %v527_v0 }
 0x132   : > { %v529_v36 = vpop.f32.mrf.mxu1 }
 0x133   : > { %v530_v37 = vadd.f32 %v987_v33, %v529_v36 }
 0x135   : > { %623 = vst [vmem:[%s994_s27 + $0x8] sm:$0xff] %v530_v37 }
 0x136   : > { %v574_v38 = vpop.f32.mrf.mxu3 }
 0x137   : > { %v575_v39 = vadd.f32 %v987_v33, %v574_v38 }
 0x139   : > { %638 = vst [vmem:[%s994_s27 + $0x80] sm:$0xff] %v575_v39 }
 0x13a   : > { %v532_v40 = vpop.f32.mrf.mxu1 }
 0x13b   : > { %v533_v41 = vadd.f32 %v987_v33, %v532_v40 }
 0x13d   : > { %624 = vst [vmem:[%s994_s27 + $0x10] sm:$0xff] %v533_v41 }
 0x13e   : > { %v577_v42 = vpop.f32.mrf.mxu3 }
 0x13f   : > { %v578_v43 = vadd.f32 %v987_v33, %v577_v42 }
 0x141   : > { %639 = vst [vmem:[%s994_s27 + $0x88] sm:$0xff] %v578_v43 }
 0x142   : > { %v535_v44 = vpop.f32.mrf.mxu1 }
 0x143   : > { %v536_v45 = vadd.f32 %v987_v33, %v535_v44 }
 0x145   : > { %625 = vst [vmem:[%s994_s27 + $0x18] sm:$0xff] %v536_v45 }
 0x146   : > { %v580_v46 = vpop.f32.mrf.mxu3 }
 0x147   : > { %v581_v47 = vadd.f32 %v987_v33, %v580_v46 }
 0x149   : > { %640 = vst [vmem:[%s994_s27 + $0x90] sm:$0xff] %v581_v47 }
 0x14a   : > { %v538_v48 = vpop.f32.mrf.mxu1 }
 0x14b   : > { %v539_v49 = vadd.f32 %v987_v33, %v538_v48 }
 0x14d   : > { %626 = vst [vmem:[%s994_s27 + $0x20] sm:$0xff] %v539_v49 }
 0x14e   : > { %v583_v50 = vpop.f32.mrf.mxu3 }
 0x14f   : > { %v584_v51 = vadd.f32 %v987_v33, %v583_v50 }
 0x151   : > { %641 = vst [vmem:[%s994_s27 + $0x98] sm:$0xff] %v584_v51 }
 0x152   : > { %v541_v52 = vpop.f32.mrf.mxu1 }
 0x153   : > { %v542_v53 = vadd.f32 %v987_v33, %v541_v52 }
 0x155   : > { %627 = vst [vmem:[%s994_s27 + $0x28] sm:$0xff] %v542_v53 }
 0x156   : > { %v586_v54 = vpop.f32.mrf.mxu3 }
 0x157   : > { %v587_v55 = vadd.f32 %v987_v33, %v586_v54 }
 0x159   : > { %642 = vst [vmem:[%s994_s27 + $0xa0] sm:$0xff] %v587_v55 }
 0x15a   : > { %v544_v56 = vpop.f32.mrf.mxu1 }
 0x15b   : > { %v545_v57 = vadd.f32 %v987_v33, %v544_v56 }
 0x15d   : > { %628 = vst [vmem:[%s994_s27 + $0x30] sm:$0xff] %v545_v57 }
 0x15e   : > { %v589_v58 = vpop.f32.mrf.mxu3 }
 0x15f   : > { %v590_v59 = vadd.f32 %v987_v33, %v589_v58 }
 0x161   : > { %643 = vst [vmem:[%s994_s27 + $0xa8] sm:$0xff] %v590_v59 }
 0x162   : > { %v547_v60 = vpop.f32.mrf.mxu1 }
 0x163   : > { %v548_v61 = vadd.f32 %v987_v33, %v547_v60 }
 0x165   : > { %629 = vst [vmem:[%s994_s27 + $0x38] sm:$0xff] %v548_v61 }
 0x166   : > { %v592_v62 = vpop.f32.mrf.mxu3 }
 0x167   : > { %v593_v63 = vadd.f32 %v987_v33, %v592_v62 }
 0x169   : > { %644 = vst [vmem:[%s994_s27 + $0xb0] sm:$0xff] %v593_v63 }
 0x16a   : > { %v550_v1 = vpop.f32.mrf.mxu1 }
 0x16b   : > { %v551_v2 = vadd.f32 %v987_v33, %v550_v1 }
 0x16d   : > { %630 = vst [vmem:[%s994_s27 + $0x40] sm:$0xff] %v551_v2 }
 0x16e   : > { %v595_v3 = vpop.f32.mrf.mxu3 }
 0x16f   : > { %v596_v4 = vadd.f32 %v987_v33, %v595_v3 }
 0x171   : > { %645 = vst [vmem:[%s994_s27 + $0xb8] sm:$0xff] %v596_v4 }
 0x172   : > { %v553_v5 = vpop.f32.mrf.mxu1 }
 0x173   : > { %v554_v6 = vadd.f32 %v987_v33, %v553_v5 }
 0x175   : > { %631 = vst [vmem:[%s994_s27 + $0x48] sm:$0xff] %v554_v6 }
 0x176   : > { %v598_v7 = vpop.f32.mrf.mxu3 }
 0x177   : > { %v599_v8 = vadd.f32 %v987_v33, %v598_v7 }
 0x179   : > { %646 = vst [vmem:[%s994_s27 + $0xc0] sm:$0xff] %v599_v8 }
 0x17a   : > { %v556_v9 = vpop.f32.mrf.mxu1 }
 0x17b   : > { %v557_v10 = vadd.f32 %v987_v33, %v556_v9 }
 0x17d   : > { %632 = vst [vmem:[%s994_s27 + $0x50] sm:$0xff] %v557_v10 }
 0x17e   : > { %v601_v11 = vpop.f32.mrf.mxu3 }
 0x17f   : > { %v602_v12 = vadd.f32 %v987_v33, %v601_v11 }
 0x181   : > { %647 = vst [vmem:[%s994_s27 + $0xc8] sm:$0xff] %v602_v12 }
 0x182   : > { %v559_v13 = vpop.f32.mrf.mxu1 }
 0x183   : > { %v560_v14 = vadd.f32 %v987_v33, %v559_v13 }
 0x185   : > { %633 = vst [vmem:[%s994_s27 + $0x58] sm:$0xff] %v560_v14 }
 0x186   : > { %v604_v15 = vpop.f32.mrf.mxu3 }
 0x187   : > { %v605_v16 = vadd.f32 %v987_v33, %v604_v15 }
 0x189   : > { %648 = vst [vmem:[%s994_s27 + $0xd0] sm:$0xff] %v605_v16 }
 0x18a   : > { %v562_v17 = vpop.f32.mrf.mxu1 }
 0x18b   : > { %v563_v18 = vadd.f32 %v987_v33, %v562_v17 }
 0x18d   : > { %634 = vst [vmem:[%s994_s27 + $0x60] sm:$0xff] %v563_v18 }
 0x18e   : > { %v607_v19 = vpop.f32.mrf.mxu3 }
 0x18f   : > { %v608_v20 = vadd.f32 %v987_v33, %v607_v19 }
 0x191   : > { %649 = vst [vmem:[%s994_s27 + $0xd8] sm:$0xff] %v608_v20 }
 0x192   : > { %v565_v21 = vpop.f32.mrf.mxu1 }
 0x193   : > { %v566_v22 = vadd.f32 %v987_v33, %v565_v21 }
 0x195   : > { %635 = vst [vmem:[%s994_s27 + $0x68] sm:$0xff] %v566_v22 }
 0x196   : > { %v610_v23 = vpop.f32.mrf.mxu3 }
 0x197   : > { %v611_v24 = vadd.f32 %v987_v33, %v610_v23 }
 0x199   : > { %650 = vst [vmem:[%s994_s27 + $0xe0] sm:$0xff] %v611_v24 }
 0x19a   : > { %v568_v25 = vpop.f32.mrf.mxu1 }
 0x19b   : > { %v569_v26 = vadd.f32 %v987_v33, %v568_v25 }
 0x19d   : > { %636 = vst [vmem:[%s994_s27 + $0x70] sm:$0xff] %v569_v26 }
 0x19e   : > { %v613_v27 = vpop.f32.mrf.mxu3 }
 0x19f   : > { %v614_v28 = vadd.f32 %v987_v33, %v613_v27 }
 0x1a1   : > { %651 = vst [vmem:[%s994_s27 + $0xe8] sm:$0xff] %v614_v28 }
 0x1a2   : > { %v571_v29 = vpop.f32.mrf.mxu1 }
 0x1a3   : > { %v572_v30 = vadd.f32 %v987_v33, %v571_v29 }
 0x1a5   : > { %637 = vst [vmem:[%s994_s27 + $0x78] sm:$0xff] %v572_v30 }
 0x1a6   : > { %v616_v31 = vpop.f32.mrf.mxu3 }
 0x1a7   : > { %v617_v32 = vadd.f32 %v987_v33, %v616_v31 }
 0x1a9   : > { %652 = vst [vmem:[%s994_s27 + $0xf0] sm:$0xff] %v617_v32 }
 0x1ae   : > { %v619_v34 = vpop.f32.mrf.mxu3 }
 0x1af   : > { %v620_v35 = vadd.f32 %v987_v33, %v619_v34 }
 0x1b1   : > { %653 = vst [vmem:[%s994_s27 + $0xf8] sm:$0xff] %v620_v35 }
 0x1b2 PF: > { %s15_s18 = sadd.s32 1, %s769_s18  }
 0x1b3   : > { %p12_p4 = scmp.ge.s32.totalorder %s15_s18, 4  }
 0x1b5   :  { %14 = sbr.rel (!%p12_p4) target bundleno = 1 (0x1), region = 70 }

// kernel: _ffn_pallas.1
= control target key start
LH: loop header
LB: loop body
LE: loop exit
PB: predicated region body
PF: predicated region fallthrough
CT: control target
= control target key end

     0   :  { %s801_s18 = smov 0   ;;  %s1063_s0 = inlined_call_operand.vmem [shape: f32[512,128], index: 0, kind: input, shape index: {}]   ;;  %s1064_s1 = inlined_call_operand.vmem [shape: f32[128,128], index: 1, kind: input, shape index: {}]   ;;  %s1065_s2 = inlined_call_operand.vmem [shape: f32[1,128], index: 2, kind: input, shape index: {}]   ;;  %s1066_s3 = inlined_call_operand.vmem [shape: f32[128,128], index: 3, kind: input, shape index: {}]   ;;  %s1067_s4 = inlined_call_operand.vmem [shape: f32[1,128], index: 4, kind: input, shape index: {}]   ;;  %s1068_s5 = inlined_call_operand.vmem [shape: f32[512,128], index: 5, kind: output, shape index: {}]  }
   0x1 LB: > { %s710_s19 = sadd.s32 4294967295, %s769_s18   ;;  %p714_p0 = scmp.ge.s32.totalorder %s769_s18, 1  ;;  %s769_s18 = sphi %s801_s18, %s15_s18  }
   0x2   : > { %p188_p1 = scmp.lt.s32.totalorder %s769_s18, 3 }
   0x4   : > { %p189_p2 = pnand %p714_p0, %p188_p1 }
   0x5   : > { %s715_s11 = sshll.u32 (!%p189_p2), %s710_s19, 5 }
   0x6   : > { %192 = sbr.rel (%p189_p2) target bundleno = 434 (0x1b2), region = 40  ;;  %p217_p3 = scmp.lt.s32.totalorder (!%p189_p2), %s715_s11, 63 }
   0xb   : > { %v275_v0 = vld [vmem:[%s1064_s1 + $0x78] sm:$0xff]  ;;  %v274_v1 = vld [vmem:[%s1064_s1 + $0x70] sm:$0xff]  ;;  %v273_v2 = vld [vmem:[%s1064_s1 + $0x68] sm:$0xff]  ;;  %s1070_s11 = smov (!%p217_p3, %s715_s11), 63 }
   0xc   : > { %721 = vmatpush.msra.mxu2 %v275_v0  ;;  %280 = vmatpush.msra.mxu0 %v275_v0  ;;  %v272_v3 = vld [vmem:[%s1064_s1 + $0x60] sm:$0xff]  ;;  %v271_v4 = vld [vmem:[%s1064_s1 + $0x58] sm:$0xff]  ;;  %v270_v5 = vld [vmem:[%s1064_s1 + $0x50] sm:$0xff]  ;;  %s716_s23 = sshll.u32 %s1070_s11, 3 }
   0xd   : > { %v269_v6 = vld [vmem:[%s1064_s1 + $0x48] sm:$0xff]  ;;  %v268_v7 = vld [vmem:[%s1064_s1 + $0x40] sm:$0xff]  ;;  %v267_v8 = vld [vmem:[%s1064_s1 + $0x38] sm:$0xff]  ;;  %s862_s30 = scalar_lea.vmem %s1063_s0, %s716_s23  ;;  %s994_s27 = scalar_lea.vmem %s1068_s5, %s716_s23 }
   0xe   : > { %722 = vmatpush.msra.mxu2 %v274_v1  ;;  %281 = vmatpush.msra.mxu0 %v274_v1  ;;  %v266_v9 = vld [vmem:[%s1064_s1 + $0x30] sm:$0xff]  ;;  %v265_v10 = vld [vmem:[%s1064_s1 + $0x28] sm:$0xff]  ;;  %v264_v11 = vld [vmem:[%s1064_s1 + $0x20] sm:$0xff] }
   0xf   : > { %v263_v12 = vld [vmem:[%s1064_s1 + $0x18] sm:$0xff]  ;;  %v262_v13 = vld [vmem:[%s1064_s1 + $0x10] sm:$0xff]  ;;  %v261_v14 = vld [vmem:[%s1064_s1 + $0x8] sm:$0xff] }
  0x10   : > { %723 = vmatpush.msra.mxu2 %v273_v2  ;;  %282 = vmatpush.msra.mxu0 %v273_v2  ;;  %v260_v15 = vld [vmem:[%s1064_s1] sm:$0xff]  ;;  %v245_v18 = vld [vmem:[%s862_s30 + $0x88] sm:$0xff]  ;;  %v246_v20 = vld [vmem:[%s862_s30 + $0x90] sm:$0xff] }
  0x11   : > { %v244_v16 = vld [vmem:[%s862_s30 + $0x80] sm:$0xff]  ;;  %v229_v19 = vld [vmem:[%s862_s30 + $0x8] sm:$0xff]  ;;  %v230_v21 = vld [vmem:[%s862_s30 + $0x10] sm:$0xff] }
  0x12   : > { %724 = vmatpush.msra.mxu2 %v272_v3  ;;  %283 = vmatpush.msra.mxu0 %v272_v3  ;;  %v228_v17 = vld [vmem:[%s862_s30] sm:$0xff]  ;;  %v247_v22 = vld [vmem:[%s862_s30 + $0x98] sm:$0xff]  ;;  %v249_v26 = vld [vmem:[%s862_s30 + $0xa8] sm:$0xff] }
  0x13   : > { %v231_v23 = vld [vmem:[%s862_s30 + $0x18] sm:$0xff]  ;;  %v248_v24 = vld [vmem:[%s862_s30 + $0xa0] sm:$0xff]  ;;  %v233_v27 = vld [vmem:[%s862_s30 + $0x28] sm:$0xff] }
  0x14   : > { %725 = vmatpush.msra.mxu2 %v271_v4  ;;  %284 = vmatpush.msra.mxu0 %v271_v4  ;;  %v232_v25 = vld [vmem:[%s862_s30 + $0x20] sm:$0xff]  ;;  %v250_v28 = vld [vmem:[%s862_s30 + $0xb0] sm:$0xff]  ;;  %v251_v30 = vld [vmem:[%s862_s30 + $0xb8] sm:$0xff] }
  0x15   : > { %v234_v29 = vld [vmem:[%s862_s30 + $0x30] sm:$0xff]  ;;  %v235_v31 = vld [vmem:[%s862_s30 + $0x38] sm:$0xff]  ;;  %v252_v32 = vld [vmem:[%s862_s30 + $0xc0] sm:$0xff] }
  0x16   : > { %726 = vmatpush.msra.mxu2 %v270_v5  ;;  %285 = vmatpush.msra.mxu0 %v270_v5  ;;  %v236_v33 = vld [vmem:[%s862_s30 + $0x40] sm:$0xff]  ;;  %v253_v34 = vld [vmem:[%s862_s30 + $0xc8] sm:$0xff]  ;;  %v504_v36 = vld [vmem:[%s1066_s3 + $0x78] sm:$0xff] }
  0x17   : > { %v237_v35 = vld [vmem:[%s862_s30 + $0x48] sm:$0xff]  ;;  %v503_v37 = vld [vmem:[%s1066_s3 + $0x70] sm:$0xff]  ;;  %737 = vmatpush.msra.mxu3 %v504_v36  ;;  %509 = vmatpush.msra.mxu1 %v504_v36  ;;  %v501_v39 = vld [vmem:[%s1066_s3 + $0x60] sm:$0xff] }
  0x18   : > { %727 = vmatpush.msra.mxu2 %v269_v6  ;;  %286 = vmatpush.msra.mxu0 %v269_v6  ;;  %v502_v38 = vld [vmem:[%s1066_s3 + $0x68] sm:$0xff]  ;;  %v254_v40 = vld [vmem:[%s862_s30 + $0xd0] sm:$0xff]  ;;  %v500_v42 = vld [vmem:[%s1066_s3 + $0x58] sm:$0xff] }
  0x19   : > { %738 = vmatpush.msra.mxu3 %v503_v37  ;;  %510 = vmatpush.msra.mxu1 %v503_v37  ;;  %v238_v41 = vld [vmem:[%s862_s30 + $0x50] sm:$0xff]  ;;  %v498_v44 = vld [vmem:[%s1066_s3 + $0x48] sm:$0xff]  ;;  %v497_v45 = vld [vmem:[%s1066_s3 + $0x40] sm:$0xff] }
  0x1a   : > { %728 = vmatpush.msra.mxu2 %v268_v7  ;;  %287 = vmatpush.msra.mxu0 %v268_v7  ;;  %v499_v43 = vld [vmem:[%s1066_s3 + $0x50] sm:$0xff]  ;;  %v255_v46 = vld [vmem:[%s862_s30 + $0xd8] sm:$0xff]  ;;  %v494_v50 = vld [vmem:[%s1066_s3 + $0x28] sm:$0xff] }
  0x1b   : > { %739 = vmatpush.msra.mxu3 %v502_v38  ;;  %511 = vmatpush.msra.mxu1 %v502_v38  ;;  %v239_v47 = vld [vmem:[%s862_s30 + $0x58] sm:$0xff]  ;;  %v495_v49 = vld [vmem:[%s1066_s3 + $0x30] sm:$0xff]  ;;  %v493_v51 = vld [vmem:[%s1066_s3 + $0x20] sm:$0xff] }
  0x1c   : > { %729 = vmatpush.msra.mxu2 %v267_v8  ;;  %288 = vmatpush.msra.mxu0 %v267_v8  ;;  %v496_v48 = vld [vmem:[%s1066_s3 + $0x38] sm:$0xff]  ;;  %v256_v52 = vld [vmem:[%s862_s30 + $0xe0] sm:$0xff]  ;;  %v491_v55 = vld [vmem:[%s1066_s3 + $0x10] sm:$0xff] }
  0x1d   : > { %740 = vmatpush.msra.mxu3 %v501_v39  ;;  %512 = vmatpush.msra.mxu1 %v501_v39  ;;  %v240_v53 = vld [vmem:[%s862_s30 + $0x60] sm:$0xff]  ;;  %v492_v54 = vld [vmem:[%s1066_s3 + $0x18] sm:$0xff]  ;;  %v490_v56 = vld [vmem:[%s1066_s3 + $0x8] sm:$0xff] }
  0x1e   : > { %730 = vmatpush.msra.mxu2 %v266_v9  ;;  %289 = vmatpush.msra.mxu0 %v266_v9  ;;  %v257_v57 = vld [vmem:[%s862_s30 + $0xe8] sm:$0xff]  ;;  %v489_v59 = vld [vmem:[%s1066_s3] sm:$0xff]  ;;  %v258_v60 = vld [vmem:[%s862_s30 + $0xf0] sm:$0xff] }
  0x1f   : > { %741 = vmatpush.msra.mxu3 %v500_v42  ;;  %513 = vmatpush.msra.mxu1 %v500_v42  ;;  %v241_v58 = vld [vmem:[%s862_s30 + $0x68] sm:$0xff]  ;;  %v242_v61 = vld [vmem:[%s862_s30 + $0x70] sm:$0xff]  ;;  %v259_v62 = vld [vmem:[%s862_s30 + $0xf8] sm:$0xff] }
  0x20   : > { %731 = vmatpush.msra.mxu2 %v265_v10  ;;  %290 = vmatpush.msra.mxu0 %v265_v10  ;;  %v243_v63 = vld [vmem:[%s862_s30 + $0x78] sm:$0xff]  ;;  %v950_v0 = vld [vmem:[%s1065_s2] ss:$0 sm:$0xff] }
  0x21   : > { %742 = vmatpush.msra.mxu3 %v499_v43  ;;  %514 = vmatpush.msra.mxu1 %v499_v43 }
  0x22   : > { %732 = vmatpush.msra.mxu2 %v264_v11  ;;  %291 = vmatpush.msra.mxu0 %v264_v11 }
  0x23   : > { %743 = vmatpush.msra.mxu3 %v498_v44  ;;  %515 = vmatpush.msra.mxu1 %v498_v44 }
  0x24   : > { %733 = vmatpush.msra.mxu2 %v263_v12  ;;  %292 = vmatpush.msra.mxu0 %v263_v12 }
  0x25   : > { %744 = vmatpush.msra.mxu3 %v497_v45  ;;  %516 = vmatpush.msra.mxu1 %v497_v45 }
  0x26   : > { %734 = vmatpush.msra.mxu2 %v262_v13  ;;  %293 = vmatpush.msra.mxu0 %v262_v13 }
  0x27   : > { %745 = vmatpush.msra.mxu3 %v496_v48  ;;  %517 = vmatpush.msra.mxu1 %v496_v48 }
  0x28   : > { %735 = vmatpush.msra.mxu2 %v261_v14  ;;  %294 = vmatpush.msra.mxu0 %v261_v14 }
  0x29   : > { %746 = vmatpush.msra.mxu3 %v495_v49  ;;  %518 = vmatpush.msra.mxu1 %v495_v49 }
  0x2a   : > { %736 = vmatpush.msra.mxu2 %v260_v15  ;;  %295 = vmatpush.msra.mxu0 %v260_v15 }
  0x2b   : > { %344 = vmatmul.f32.vlgmr.msra.gmra.mxu2 %v244_v16  ;;  %296 = vmatmul.f32.vlgmr.msra.gmra.mxu0 %v228_v17 }
  0x2c   : > { %747 = vmatpush.msra.mxu3 %v494_v50  ;;  %519 = vmatpush.msra.mxu1 %v494_v50 }
  0x2e   : > { %748 = vmatpush.msra.mxu3 %v493_v51  ;;  %520 = vmatpush.msra.mxu1 %v493_v51 }
  0x30   : > { %749 = vmatpush.msra.mxu3 %v492_v54  ;;  %521 = vmatpush.msra.mxu1 %v492_v54 }
  0x32   : > { %750 = vmatpush.msra.mxu3 %v491_v55  ;;  %522 = vmatpush.msra.mxu1 %v491_v55 }
  0x33   : > { %347 = vmatmul.f32.gmra.mxu2 %v245_v18  ;;  %299 = vmatmul.f32.gmra.mxu0 %v229_v19 }
  0x34   : > { %751 = vmatpush.msra.mxu3 %v490_v56  ;;  %523 = vmatpush.msra.mxu1 %v490_v56 }
  0x36   : > { %752 = vmatpush.msra.mxu3 %v489_v59  ;;  %524 = vmatpush.msra.mxu1 %v489_v59 }
  0x3b   : > { %350 = vmatmul.f32.gmra.mxu2 %v246_v20  ;;  %302 = vmatmul.f32.gmra.mxu0 %v230_v21 }
  0x43   : > { %353 = vmatmul.f32.gmra.mxu2 %v247_v22  ;;  %305 = vmatmul.f32.gmra.mxu0 %v231_v23 }
  0x4b   : > { %356 = vmatmul.f32.gmra.mxu2 %v248_v24  ;;  %308 = vmatmul.f32.gmra.mxu0 %v232_v25 }
  0x53   : > { %359 = vmatmul.f32.gmra.mxu2 %v249_v26  ;;  %311 = vmatmul.f32.gmra.mxu0 %v233_v27 }
  0x5b   : > { %362 = vmatmul.f32.gmra.mxu2 %v250_v28  ;;  %314 = vmatmul.f32.gmra.mxu0 %v234_v29 }
  0x63   : > { %365 = vmatmul.f32.gmra.mxu2 %v251_v30  ;;  %317 = vmatmul.f32.gmra.mxu0 %v235_v31 }
  0x6b   : > { %368 = vmatmul.f32.gmra.mxu2 %v252_v32  ;;  %320 = vmatmul.f32.gmra.mxu0 %v236_v33 }
  0x73   : > { %371 = vmatmul.f32.gmra.mxu2 %v253_v34  ;;  %323 = vmatmul.f32.gmra.mxu0 %v237_v35 }
  0x7b   : > { %374 = vmatmul.f32.gmra.mxu2 %v254_v40  ;;  %326 = vmatmul.f32.gmra.mxu0 %v238_v41 }
  0x83   : > { %377 = vmatmul.f32.gmra.mxu2 %v255_v46  ;;  %329 = vmatmul.f32.gmra.mxu0 %v239_v47 }
  0x8b   : > { %380 = vmatmul.f32.gmra.mxu2 %v256_v52  ;;  %332 = vmatmul.f32.gmra.mxu0 %v240_v53 }
  0x93   : > { %383 = vmatmul.f32.gmra.mxu2 %v257_v57  ;;  %335 = vmatmul.f32.gmra.mxu0 %v241_v58 }
  0x9b   : > { %386 = vmatmul.f32.gmra.mxu2 %v258_v60  ;;  %338 = vmatmul.f32.gmra.mxu0 %v242_v61 }
  0xa3   : > { %389 = vmatmul.f32.gmra.mxu2 %v259_v62  ;;  %341 = vmatmul.f32.gmra.mxu0 %v243_v63 }
  0xa8   : > { %v297_v1 = vpop.f32.mrf.mxu0 }
  0xa9   : > { %v298_v2 = vadd.f32 %v950_v0, %v297_v1 }
  0xab   : > { %v393_v3 = vmax.f32 %v298_v2, 0.0 }
  0xad   : > { %525 = vmatmul.f32.vlgmr.msra.gmra.mxu1 %v393_v3 }
  0xae   : > { %v345_v4 = vpop.f32.mrf.mxu2 }
  0xaf   : > { %v346_v5 = vadd.f32 %v950_v0, %v345_v4 }
  0xb0   : > { %v300_v6 = vpop.f32.mrf.mxu0 }
  0xb1   : > { %v409_v7 = vmax.f32 %v346_v5, 0.0  ;;  %v301_v8 = vadd.f32 %v950_v0, %v300_v6 }
  0xb3   : > { %573 = vmatmul.f32.vlgmr.msra.gmra.mxu3 %v409_v7  ;;  %v394_v9 = vmax.f32 %v301_v8, 0.0 }
  0xb5   : > { %528 = vmatmul.f32.gmra.mxu1 %v394_v9 }
  0xb6   : > { %v348_v10 = vpop.f32.mrf.mxu2 }
  0xb7   : > { %v349_v11 = vadd.f32 %v950_v0, %v348_v10 }
  0xb8   : > { %v303_v12 = vpop.f32.mrf.mxu0 }
  0xb9   : > { %v410_v13 = vmax.f32 %v349_v11, 0.0  ;;  %v304_v14 = vadd.f32 %v950_v0, %v303_v12 }
  0xbb   : > { %576 = vmatmul.f32.gmra.mxu3 %v410_v13  ;;  %v395_v15 = vmax.f32 %v304_v14, 0.0 }
  0xbd   : > { %531 = vmatmul.f32.gmra.mxu1 %v395_v15 }
  0xbe   : > { %v351_v16 = vpop.f32.mrf.mxu2 }
  0xbf   : > { %v352_v17 = vadd.f32 %v950_v0, %v351_v16 }
  0xc0   : > { %v306_v18 = vpop.f32.mrf.mxu0 }
  0xc1   : > { %v411_v19 = vmax.f32 %v352_v17, 0.0  ;;  %v307_v20 = vadd.f32 %v950_v0, %v306_v18 }
  0xc3   : > { %579 = vmatmul.f32.gmra.mxu3 %v411_v19  ;;  %v396_v21 = vmax.f32 %v307_v20, 0.0 }
  0xc5   : > { %534 = vmatmul.f32.gmra.mxu1 %v396_v21 }
  0xc6   : > { %v354_v22 = vpop.f32.mrf.mxu2 }
  0xc7   : > { %v355_v23 = vadd.f32 %v950_v0, %v354_v22 }
  0xc8   : > { %v309_v24 = vpop.f32.mrf.mxu0 }
  0xc9   : > { %v412_v25 = vmax.f32 %v355_v23, 0.0  ;;  %v310_v26 = vadd.f32 %v950_v0, %v309_v24 }
  0xcb   : > { %582 = vmatmul.f32.gmra.mxu3 %v412_v25  ;;  %v397_v27 = vmax.f32 %v310_v26, 0.0 }
  0xcd   : > { %537 = vmatmul.f32.gmra.mxu1 %v397_v27 }
  0xce   : > { %v357_v28 = vpop.f32.mrf.mxu2 }
  0xcf   : > { %v358_v29 = vadd.f32 %v950_v0, %v357_v28 }
  0xd0   : > { %v312_v30 = vpop.f32.mrf.mxu0 }
  0xd1   : > { %v413_v31 = vmax.f32 %v358_v29, 0.0  ;;  %v313_v32 = vadd.f32 %v950_v0, %v312_v30 }
  0xd3   : > { %585 = vmatmul.f32.gmra.mxu3 %v413_v31  ;;  %v398_v33 = vmax.f32 %v313_v32, 0.0 }
  0xd5   : > { %540 = vmatmul.f32.gmra.mxu1 %v398_v33  ;;  %v987_v33 = vld [vmem:[%s1067_s4] ss:$0 sm:$0xff] }
  0xd6   : > { %v360_v34 = vpop.f32.mrf.mxu2 }
  0xd7   : > { %v361_v35 = vadd.f32 %v950_v0, %v360_v34 }
  0xd8   : > { %v315_v36 = vpop.f32.mrf.mxu0 }
  0xd9   : > { %v414_v37 = vmax.f32 %v361_v35, 0.0  ;;  %v316_v38 = vadd.f32 %v950_v0, %v315_v36 }
  0xdb   : > { %588 = vmatmul.f32.gmra.mxu3 %v414_v37  ;;  %v399_v39 = vmax.f32 %v316_v38, 0.0 }
  0xdd   : > { %543 = vmatmul.f32.gmra.mxu1 %v399_v39 }
  0xde   : > { %v363_v40 = vpop.f32.mrf.mxu2 }
  0xdf   : > { %v364_v41 = vadd.f32 %v950_v0, %v363_v40 }
  0xe0   : > { %v318_v42 = vpop.f32.mrf.mxu0 }
  0xe1   : > { %v415_v43 = vmax.f32 %v364_v41, 0.0  ;;  %v319_v44 = vadd.f32 %v950_v0, %v318_v42 }
  0xe3   : > { %591 = vmatmul.f32.gmra.mxu3 %v415_v43  ;;  %v400_v45 = vmax.f32 %v319_v44, 0.0 }
  0xe5   : > { %546 = vmatmul.f32.gmra.mxu1 %v400_v45 }
  0xe6   : > { %v366_v46 = vpop.f32.mrf.mxu2 }
  0xe7   : > { %v367_v47 = vadd.f32 %v950_v0, %v366_v46 }
  0xe8   : > { %v321_v48 = vpop.f32.mrf.mxu0 }
  0xe9   : > { %v416_v49 = vmax.f32 %v367_v47, 0.0  ;;  %v322_v50 = vadd.f32 %v950_v0, %v321_v48 }
  0xeb   : > { %594 = vmatmul.f32.gmra.mxu3 %v416_v49  ;;  %v401_v51 = vmax.f32 %v322_v50, 0.0 }
  0xed   : > { %549 = vmatmul.f32.gmra.mxu1 %v401_v51 }
  0xee   : > { %v369_v52 = vpop.f32.mrf.mxu2 }
  0xef   : > { %v370_v53 = vadd.f32 %v950_v0, %v369_v52 }
  0xf0   : > { %v324_v54 = vpop.f32.mrf.mxu0 }
  0xf1   : > { %v417_v55 = vmax.f32 %v370_v53, 0.0  ;;  %v325_v56 = vadd.f32 %v950_v0, %v324_v54 }
  0xf3   : > { %597 = vmatmul.f32.gmra.mxu3 %v417_v55  ;;  %v402_v57 = vmax.f32 %v325_v56, 0.0 }
  0xf5   : > { %552 = vmatmul.f32.gmra.mxu1 %v402_v57 }
  0xf6   : > { %v372_v58 = vpop.f32.mrf.mxu2 }
  0xf7   : > { %v373_v59 = vadd.f32 %v950_v0, %v372_v58 }
  0xf8   : > { %v327_v60 = vpop.f32.mrf.mxu0 }
  0xf9   : > { %v418_v61 = vmax.f32 %v373_v59, 0.0  ;;  %v328_v62 = vadd.f32 %v950_v0, %v327_v60 }
  0xfb   : > { %600 = vmatmul.f32.gmra.mxu3 %v418_v61  ;;  %v403_v63 = vmax.f32 %v328_v62, 0.0 }
  0xfd   : > { %555 = vmatmul.f32.gmra.mxu1 %v403_v63 }
  0xfe   : > { %v375_v1 = vpop.f32.mrf.mxu2 }
  0xff   : > { %v376_v2 = vadd.f32 %v950_v0, %v375_v1 }
 0x100   : > { %v330_v3 = vpop.f32.mrf.mxu0 }
 0x101   : > { %v419_v4 = vmax.f32 %v376_v2, 0.0  ;;  %v331_v5 = vadd.f32 %v950_v0, %v330_v3 }
 0x103   : > { %603 = vmatmul.f32.gmra.mxu3 %v419_v4  ;;  %v404_v6 = vmax.f32 %v331_v5, 0.0 }
 0x105   : > { %558 = vmatmul.f32.gmra.mxu1 %v404_v6 }
 0x106   : > { %v378_v7 = vpop.f32.mrf.mxu2 }
 0x107   : > { %v379_v8 = vadd.f32 %v950_v0, %v378_v7 }
 0x108   : > { %v333_v9 = vpop.f32.mrf.mxu0 }
 0x109   : > { %v420_v10 = vmax.f32 %v379_v8, 0.0  ;;  %v334_v11 = vadd.f32 %v950_v0, %v333_v9 }
 0x10b   : > { %606 = vmatmul.f32.gmra.mxu3 %v420_v10  ;;  %v405_v12 = vmax.f32 %v334_v11, 0.0 }
 0x10d   : > { %561 = vmatmul.f32.gmra.mxu1 %v405_v12 }
 0x10e   : > { %v381_v13 = vpop.f32.mrf.mxu2 }
 0x10f   : > { %v382_v14 = vadd.f32 %v950_v0, %v381_v13 }
 0x110   : > { %v336_v15 = vpop.f32.mrf.mxu0 }
 0x111   : > { %v421_v16 = vmax.f32 %v382_v14, 0.0  ;;  %v337_v17 = vadd.f32 %v950_v0, %v336_v15 }
 0x113   : > { %609 = vmatmul.f32.gmra.mxu3 %v421_v16  ;;  %v406_v18 = vmax.f32 %v337_v17, 0.0 }
 0x115   : > { %564 = vmatmul.f32.gmra.mxu1 %v406_v18 }
 0x116   : > { %v384_v19 = vpop.f32.mrf.mxu2 }
 0x117   : > { %v385_v20 = vadd.f32 %v950_v0, %v384_v19 }
 0x118   : > { %v339_v21 = vpop.f32.mrf.mxu0 }
 0x119   : > { %v422_v22 = vmax.f32 %v385_v20, 0.0  ;;  %v340_v23 = vadd.f32 %v950_v0, %v339_v21 }
 0x11b   : > { %612 = vmatmul.f32.gmra.mxu3 %v422_v22  ;;  %v407_v24 = vmax.f32 %v340_v23, 0.0 }
 0x11d   : > { %567 = vmatmul.f32.gmra.mxu1 %v407_v24 }
 0x11e   : > { %v387_v25 = vpop.f32.mrf.mxu2 }
 0x11f   : > { %v388_v26 = vadd.f32 %v950_v0, %v387_v25 }
 0x120   : > { %v342_v27 = vpop.f32.mrf.mxu0 }
 0x121   : > { %v423_v28 = vmax.f32 %v388_v26, 0.0  ;;  %v343_v29 = vadd.f32 %v950_v0, %v342_v27 }
 0x123   : > { %615 = vmatmul.f32.gmra.mxu3 %v423_v28  ;;  %v408_v30 = vmax.f32 %v343_v29, 0.0 }
 0x125   : > { %570 = vmatmul.f32.gmra.mxu1 %v408_v30 }
 0x126   : > { %v390_v31 = vpop.f32.mrf.mxu2 }
 0x127   : > { %v391_v32 = vadd.f32 %v950_v0, %v390_v31 }
 0x129   : > { %v424_v34 = vmax.f32 %v391_v32, 0.0 }
 0x12a   : > { %v526_v35 = vpop.f32.mrf.mxu1 }
 0x12b   : > { %618 = vmatmul.f32.gmra.mxu3 %v424_v34  ;;  %v527_v0 = vadd.f32 %v987_v33, %v526_v35 }
 0x12d   : > { %622 = vst [vmem:[%s994_s27] sm:$0xff] %v527_v0 }
 0x132   : > { %v529_v36 = vpop.f32.mrf.mxu1 }
 0x133   : > { %v530_v37 = vadd.f32 %v987_v33, %v529_v36 }
 0x135   : > { %623 = vst [vmem:[%s994_s27 + $0x8] sm:$0xff] %v530_v37 }
 0x136   : > { %v574_v38 = vpop.f32.mrf.mxu3 }
 0x137   : > { %v575_v39 = vadd.f32 %v987_v33, %v574_v38 }
 0x139   : > { %638 = vst [vmem:[%s994_s27 + $0x80] sm:$0xff] %v575_v39 }
 0x13a   : > { %v532_v40 = vpop.f32.mrf.mxu1 }
 0x13b   : > { %v533_v41 = vadd.f32 %v987_v33, %v532_v40 }
 0x13d   : > { %624 = vst [vmem:[%s994_s27 + $0x10] sm:$0xff] %v533_v41 }
 0x13e   : > { %v577_v42 = vpop.f32.mrf.mxu3 }
 0x13f   : > { %v578_v43 = vadd.f32 %v987_v33, %v577_v42 }
 0x141   : > { %639 = vst [vmem:[%s994_s27 + $0x88] sm:$0xff] %v578_v43 }
 0x142   : > { %v535_v44 = vpop.f32.mrf.mxu1 }
 0x143   : > { %v536_v45 = vadd.f32 %v987_v33, %v535_v44 }
 0x145   : > { %625 = vst [vmem:[%s994_s27 + $0x18] sm:$0xff] %v536_v45 }
 0x146   : > { %v580_v46 = vpop.f32.mrf.mxu3 }
 0x147   : > { %v581_v47 = vadd.f32 %v987_v33, %v580_v46 }
 0x149   : > { %640 = vst [vmem:[%s994_s27 + $0x90] sm:$0xff] %v581_v47 }
 0x14a   : > { %v538_v48 = vpop.f32.mrf.mxu1 }
 0x14b   : > { %v539_v49 = vadd.f32 %v987_v33, %v538_v48 }
 0x14d   : > { %626 = vst [vmem:[%s994_s27 + $0x20] sm:$0xff] %v539_v49 }
 0x14e   : > { %v583_v50 = vpop.f32.mrf.mxu3 }
 0x14f   : > { %v584_v51 = vadd.f32 %v987_v33, %v583_v50 }
 0x151   : > { %641 = vst [vmem:[%s994_s27 + $0x98] sm:$0xff] %v584_v51 }
 0x152   : > { %v541_v52 = vpop.f32.mrf.mxu1 }
 0x153   : > { %v542_v53 = vadd.f32 %v987_v33, %v541_v52 }
 0x155   : > { %627 = vst [vmem:[%s994_s27 + $0x28] sm:$0xff] %v542_v53 }
 0x156   : > { %v586_v54 = vpop.f32.mrf.mxu3 }
 0x157   : > { %v587_v55 = vadd.f32 %v987_v33, %v586_v54 }
 0x159   : > { %642 = vst [vmem:[%s994_s27 + $0xa0] sm:$0xff] %v587_v55 }
 0x15a   : > { %v544_v56 = vpop.f32.mrf.mxu1 }
 0x15b   : > { %v545_v57 = vadd.f32 %v987_v33, %v544_v56 }
 0x15d   : > { %628 = vst [vmem:[%s994_s27 + $0x30] sm:$0xff] %v545_v57 }
 0x15e   : > { %v589_v58 = vpop.f32.mrf.mxu3 }
 0x15f   : > { %v590_v59 = vadd.f32 %v987_v33, %v589_v58 }
 0x161   : > { %643 = vst [vmem:[%s994_s27 + $0xa8] sm:$0xff] %v590_v59 }
 0x162   : > { %v547_v60 = vpop.f32.mrf.mxu1 }
 0x163   : > { %v548_v61 = vadd.f32 %v987_v33, %v547_v60 }
 0x165   : > { %629 = vst [vmem:[%s994_s27 + $0x38] sm:$0xff] %v548_v61 }
 0x166   : > { %v592_v62 = vpop.f32.mrf.mxu3 }
 0x167   : > { %v593_v63 = vadd.f32 %v987_v33, %v592_v62 }
 0x169   : > { %644 = vst [vmem:[%s994_s27 + $0xb0] sm:$0xff] %v593_v63 }
 0x16a   : > { %v550_v1 = vpop.f32.mrf.mxu1 }
 0x16b   : > { %v551_v2 = vadd.f32 %v987_v33, %v550_v1 }
 0x16d   : > { %630 = vst [vmem:[%s994_s27 + $0x40] sm:$0xff] %v551_v2 }
 0x16e   : > { %v595_v3 = vpop.f32.mrf.mxu3 }
 0x16f   : > { %v596_v4 = vadd.f32 %v987_v33, %v595_v3 }
 0x171   : > { %645 = vst [vmem:[%s994_s27 + $0xb8] sm:$0xff] %v596_v4 }
 0x172   : > { %v553_v5 = vpop.f32.mrf.mxu1 }
 0x173   : > { %v554_v6 = vadd.f32 %v987_v33, %v553_v5 }
 0x175   : > { %631 = vst [vmem:[%s994_s27 + $0x48] sm:$0xff] %v554_v6 }
 0x176   : > { %v598_v7 = vpop.f32.mrf.mxu3 }
 0x177   : > { %v599_v8 = vadd.f32 %v987_v33, %v598_v7 }
 0x179   : > { %646 = vst [vmem:[%s994_s27 + $0xc0] sm:$0xff] %v599_v8 }
 0x17a   : > { %v556_v9 = vpop.f32.mrf.mxu1 }
 0x17b   : > { %v557_v10 = vadd.f32 %v987_v33, %v556_v9 }
 0x17d   : > { %632 = vst [vmem:[%s994_s27 + $0x50] sm:$0xff] %v557_v10 }
 0x17e   : > { %v601_v11 = vpop.f32.mrf.mxu3 }
 0x17f   : > { %v602_v12 = vadd.f32 %v987_v33, %v601_v11 }
 0x181   : > { %647 = vst [vmem:[%s994_s27 + $0xc8] sm:$0xff] %v602_v12 }
 0x182   : > { %v559_v13 = vpop.f32.mrf.mxu1 }
 0x183   : > { %v560_v14 = vadd.f32 %v987_v33, %v559_v13 }
 0x185   : > { %633 = vst [vmem:[%s994_s27 + $0x58] sm:$0xff] %v560_v14 }
 0x186   : > { %v604_v15 = vpop.f32.mrf.mxu3 }
 0x187   : > { %v605_v16 = vadd.f32 %v987_v33, %v604_v15 }
 0x189   : > { %648 = vst [vmem:[%s994_s27 + $0xd0] sm:$0xff] %v605_v16 }
 0x18a   : > { %v562_v17 = vpop.f32.mrf.mxu1 }
 0x18b   : > { %v563_v18 = vadd.f32 %v987_v33, %v562_v17 }
 0x18d   : > { %634 = vst [vmem:[%s994_s27 + $0x60] sm:$0xff] %v563_v18 }
 0x18e   : > { %v607_v19 = vpop.f32.mrf.mxu3 }
 0x18f   : > { %v608_v20 = vadd.f32 %v987_v33, %v607_v19 }
 0x191   : > { %649 = vst [vmem:[%s994_s27 + $0xd8] sm:$0xff] %v608_v20 }
 0x192   : > { %v565_v21 = vpop.f32.mrf.mxu1 }
 0x193   : > { %v566_v22 = vadd.f32 %v987_v33, %v565_v21 }
 0x195   : > { %635 = vst [vmem:[%s994_s27 + $0x68] sm:$0xff] %v566_v22 }
 0x196   : > { %v610_v23 = vpop.f32.mrf.mxu3 }
 0x197   : > { %v611_v24 = vadd.f32 %v987_v33, %v610_v23 }
 0x199   : > { %650 = vst [vmem:[%s994_s27 + $0xe0] sm:$0xff] %v611_v24 }
 0x19a   : > { %v568_v25 = vpop.f32.mrf.mxu1 }
 0x19b   : > { %v569_v26 = vadd.f32 %v987_v33, %v568_v25 }
 0x19d   : > { %636 = vst [vmem:[%s994_s27 + $0x70] sm:$0xff] %v569_v26 }
 0x19e   : > { %v613_v27 = vpop.f32.mrf.mxu3 }
 0x19f   : > { %v614_v28 = vadd.f32 %v987_v33, %v613_v27 }
 0x1a1   : > { %651 = vst [vmem:[%s994_s27 + $0xe8] sm:$0xff] %v614_v28 }
 0x1a2   : > { %v571_v29 = vpop.f32.mrf.mxu1 }
 0x1a3   : > { %v572_v30 = vadd.f32 %v987_v33, %v571_v29 }
 0x1a5   : > { %637 = vst [vmem:[%s994_s27 + $0x78] sm:$0xff] %v572_v30 }
 0x1a6   : > { %v616_v31 = vpop.f32.mrf.mxu3 }
 0x1a7   : > { %v617_v32 = vadd.f32 %v987_v33, %v616_v31 }
 0x1a9   : > { %652 = vst [vmem:[%s994_s27 + $0xf0] sm:$0xff] %v617_v32 }
 0x1ae   : > { %v619_v34 = vpop.f32.mrf.mxu3 }
 0x1af   : > { %v620_v35 = vadd.f32 %v987_v33, %v619_v34 }
 0x1b1   : > { %653 = vst [vmem:[%s994_s27 + $0xf8] sm:$0xff] %v620_v35 }
 0x1b2 PF: > { %s15_s18 = sadd.s32 1, %s769_s18  }
 0x1b3   : > { %p12_p4 = scmp.ge.s32.totalorder %s15_s18, 4  }
 0x1b5   :  { %14 = sbr.rel (!%p12_p4) target bundleno = 1 (0x1), region = 70 }

</bundles_post_ra>
